<compile_context>
chip_gen: v7x
topology: tpu7x:2x2x1
jax: 0.10.0
libtpu: 0.0.40
codegen_flags: <defaults>
</compile_context>

<pallas_src>
import functools

import jax
import jax.numpy as jnp
import numpy as np
from jax.experimental import pallas as pl
from jax.experimental.pallas import tpu as pltpu

EPS = 1e-8
LANE = 128
SUBLANE = 8
MiB = 1024 * 1024


def _round_up(n, m):
    return ((n + m - 1) // m) * m


def _cdiv(a, b):
    return (a + b - 1) // b


def _tpu_budgets():
    """Generation-aware VMEM limit / TensorCore count.

    v5e/v6e: 128 MiB VMEM, 1 TC.  v7x: 64 MiB VMEM, 2 TC.  Falls back to
    conservative defaults (48 MiB / 2 cores) if the query is unavailable.
    """
    vmem_cap = 64 * MiB
    num_cores = 2
    try:
        info = pltpu.get_tpu_info()
        vmem_cap = int(getattr(info, "vmem_capacity_bytes", vmem_cap))
        for attr in ("num_cores", "tensor_cores_per_chip", "num_tensorcores"):
            v = getattr(info, attr, None)
            if v:
                num_cores = int(v)
                break
    except Exception:
        pass
    # Leave ~1/4 of physical VMEM as headroom for compiler-internal scratch:
    # 96 MiB on v5e/v6e, 48 MiB on v7x.
    vmem_limit = max(32 * MiB, (vmem_cap * 3) // 4)
    return vmem_limit, max(1, num_cores)


def prepare_params(w1, b1, w2, b2, *, mxu_tile=256):
    """One-time host-side parameter prep (hoisted out of the per-step path).

    Weights are cast to bf16 for native-rate MXU.  Only the *hidden* dim is
    zero-padded, and only when it exceeds one lane tile (padding is numerically
    inert: tanh(0)=0 and zero rows of w2 contribute nothing).  d_in / d_out are
    never padded — Mosaic handles the narrow dot dims.
    """
    d_in, hid = w1.shape
    d_out = w2.shape[1]
    hp = _round_up(hid, mxu_tile) if hid > LANE else hid
    if hp == hid:
        w1p = w1.astype(jnp.bfloat16)
        b1p = b1.reshape(1, hid).astype(jnp.float32)
        w2p = w2.astype(jnp.bfloat16)
    else:
        w1p = jnp.zeros((d_in, hp), jnp.bfloat16).at[:, :hid].set(w1.astype(jnp.bfloat16))
        b1p = jnp.zeros((1, hp), jnp.float32).at[:, :hid].set(
            b1.reshape(1, hid).astype(jnp.float32))
        w2p = jnp.zeros((hp, d_out), jnp.bfloat16).at[:hid, :].set(w2.astype(jnp.bfloat16))
    b2p = b2.reshape(1, d_out).astype(jnp.float32)
    return w1p, b1p, w2p, b2p


def _datacondition_kernel(x_ref, y_ref, w1_ref, b1_ref, w2_ref, b2_ref,
                          part_ref, *, batch_tile, true_batch, n_tiles):
    i = pl.program_id(0)

    # bf16 MXU operands (in-register cast: no extra HBM traffic), f32 accumulate.
    x = x_ref[...].astype(jnp.bfloat16)          # (TB, d_in)
    y = y_ref[...]                               # (TB, d_out)  f32 norm math
    b1 = b1_ref[...]                             # (1, hp)      read once
    b2 = b2_ref[...]                             # (1, d_out)

    h = jnp.tanh(jnp.dot(x, w1_ref[...], preferred_element_type=jnp.float32) + b1)
    # TODO(synk): on v6e/v7x a bf16 tanh (EUP bf16) halves EUP pressure if profiling
    # shows the EUP slot binding; kept f32 here for v5e compatibility.
    model_out = jnp.dot(h.astype(jnp.bfloat16), w2_ref[...],
                        preferred_element_type=jnp.float32) + b2

    diff = model_out - y
    diff_sq = jnp.sum(diff * diff, axis=1, keepdims=True)   # (TB, 1)
    y_sq = jnp.sum(y * y, axis=1, keepdims=True)            # (TB, 1)

    out_norm = jnp.sqrt(diff_sq)                              # torch.norm(p=2)
    inv_y_norm = pl.reciprocal(jnp.sqrt(y_sq) + EPS, approx=True)   # EUP slot
    ratio = out_norm * inv_y_norm                             # per-sample rel. error

    def write_partial(r):
        # Fully (8,128)-tiled output block -> unmasked lane/sublane-dense store.
        part = jnp.sum(r).reshape(1, 1, 1)
        part_ref[...] = jnp.broadcast_to(part, (1, SUBLANE, LANE))

    if true_batch % batch_tile == 0:
        # Static: no padded rows exist -> no iota/compare/select on any step.
        write_partial(ratio)
    else:
        rows_last = true_batch - (n_tiles - 1) * batch_tile

        @pl.when(i == n_tiles - 1)
        def _():
            row = jax.lax.broadcasted_iota(jnp.int32, (batch_tile, 1), 0)
            write_partial(jnp.where(row < rows_last, ratio, 0.0))

        @pl.when(i != n_tiles - 1)
        def _():
            write_partial(ratio)


def data_condition_loss(x, y, params, *, weight=1.0, batch_tile=None):
    """weight * mean_b( ||module(x_b) - y_b||_2 / (||y_b||_2 + eps) )."""
    w1p, b1p, w2p, b2p = params
    B, d_in = x.shape
    By, d_out = y.shape
    assert By == B and w1p.shape[0] == d_in and w2p.shape[1] == d_out
    hp = w1p.shape[1]

    vmem_limit, num_cores = _tpu_budgets()
    x_itemsize = jnp.dtype(x.dtype).itemsize

    # Constant-index weight/bias blocks are single-buffered (Buffered(1)) -> 1x.
    weight_bytes = (w1p.size * w1p.dtype.itemsize + w2p.size * w2p.dtype.itemsize
                    + b1p.size * 4 + b2p.size * 4)
    tile_budget = max(vmem_limit - weight_bytes - 4 * MiB, 1 * MiB)

    if batch_tile is None:
        # Double-buffered x/y tiles + per-row f32 intermediates (h, model_out, diff).
        per_row = 2 * (d_in * x_itemsize + d_out * 4) + 4 * (hp + 2 * d_out) + 64
        max_rows = max(SUBLANE, tile_budget // per_row)
        align = 256 if B >= 512 else SUBLANE        # full-M MXU passes at large B
        batch_tile = min(max_rows, _round_up(B, align), 2048)
        if num_cores > 1 and B > align:
            # Keep >= num_cores grid steps so "parallel" fills every TC (v7x).
            batch_tile = min(batch_tile, _round_up(_cdiv(B, num_cores), align))
        batch_tile = max(align, (batch_tile // align) * align)
    batch_tile = _round_up(batch_tile, SUBLANE)

    B_pad = _round_up(B, batch_tile)
    n_tiles = B_pad // batch_tile

    y = y.astype(jnp.float32)
    if B_pad != B:
        # Only the ragged tail rows are padded; NO lane padding of x / y.
        x = jnp.zeros((B_pad, d_in), x.dtype).at[:B].set(x)
        y = jnp.zeros((B_pad, d_out), jnp.float32).at[:B].set(y)

    kernel = functools.partial(_datacondition_kernel, batch_tile=batch_tile,
                               true_batch=B, n_tiles=n_tiles)

    cost = pl.CostEstimate(
        flops=2 * B_pad * hp * (d_in + d_out) + 10 * B_pad * d_out,
        transcendentals=B_pad * (hp + 3),
        bytes_accessed=(B_pad * (d_in * x_itemsize + d_out * 4)
                        + weight_bytes + n_tiles * SUBLANE * LANE * 4),
    )

    def wspec(shape):
        # Constant-index blocks: fetched once, single-buffered.
        return pl.BlockSpec(shape, lambda i: (0, 0), pipeline_mode=pl.Buffered(1))

    partials = pl.pallas_call(
        kernel,
        out_shape=jax.ShapeDtypeStruct((n_tiles, SUBLANE, LANE), jnp.float32),
        grid_spec=pltpu.PrefetchScalarGridSpec(
            num_scalar_prefetch=0,
            grid=(n_tiles,),
            in_specs=[
                pl.BlockSpec((batch_tile, d_in), lambda i: (i, 0)),   # x, true width
                pl.BlockSpec((batch_tile, d_out), lambda i: (i, 0)),  # y, true width
                wspec((d_in, hp)),                                    # w1 (bf16)
                wspec((1, hp)),                                       # b1
                wspec((hp, d_out)),                                   # w2 (bf16)
                wspec((1, d_out)),                                    # b2
            ],
            out_specs=pl.BlockSpec((1, SUBLANE, LANE), lambda i: (i, 0, 0)),
        ),
        compiler_params=pltpu.CompilerParams(
            dimension_semantics=("parallel",),     # disjoint output slots per tile
            vmem_limit_bytes=vmem_limit,           # generation-aware (96 / 48 MiB)
        ),
        cost_estimate=cost,
    )(x, y, w1p, b1p, w2p, b2p)

    # Tiny epilogue: per-tile partial sums live in element [t, 0, 0].
    return weight * jnp.sum(partials[:, 0, 0]) / B


def _reference_loss(x, y, w1, b1, w2, b2, weight=1.0, bf16_matmul=False):
    if bf16_matmul:
        xd, w1d, w2d = (x.astype(jnp.bfloat16), w1.astype(jnp.bfloat16),
                        w2.astype(jnp.bfloat16))
    else:
        xd, w1d, w2d = x, w1, w2
    h = jnp.tanh(jnp.dot(xd, w1d, preferred_element_type=jnp.float32)
                 + b1.reshape(1, -1))
    hd = h.astype(jnp.bfloat16) if bf16_matmul else h
    model_out = (jnp.dot(hd, w2d, preferred_element_type=jnp.float32)
                 + b2.reshape(1, -1))
    out_norm = jnp.sqrt(jnp.sum((model_out - y) ** 2, axis=1))
    y_norm = jnp.sqrt(jnp.sum(y ** 2, axis=1)) + EPS
    return weight * jnp.mean(out_norm / y_norm)


if __name__ == "__main__":
    # TODO(synk): the PyTorch dataloader iteration / use_full_dataset accumulation
    # loop and the optional constrain_fn are host-side control flow with no clean
    # Pallas equivalent; a single (x, y) batch on the default norm=2 /
    # relative=True path is implemented.
    key = jax.random.PRNGKey(0)
    k_x, k_y, k_w1, k_b1, k_w2, k_b2 = jax.random.split(key, 6)

    B, D_IN, HID, D_OUT = 16, 4, 32, 4      # small shapes consistent with a data fit
    x = jax.random.normal(k_x, (B, D_IN), dtype=jnp.float32)
    y = jax.random.normal(k_y, (B, D_OUT), dtype=jnp.float32)

    # Deterministic synthetic "module" parameters (2-layer MLP).
    w1 = 0.3 * jax.random.normal(k_w1, (D_IN, HID), dtype=jnp.float32)
    b1 = 0.1 * jax.random.normal(k_b1, (1, HID), dtype=jnp.float32)
    w2 = 0.3 * jax.random.normal(k_w2, (HID, D_OUT), dtype=jnp.float32)
    b2 = 0.1 * jax.random.normal(k_b2, (1, D_OUT), dtype=jnp.float32)

    params = prepare_params(w1, b1, w2, b2)      # hoisted one-time weight prep
    loss = data_condition_loss(x, y, params, weight=1.0)
    loss = jax.block_until_ready(loss)

    # Precision-matched reference (bf16 matmul operands, f32 accumulate / norms).
    ref_matched = _reference_loss(x, y, w1, b1, w2, b2, bf16_matmul=True)
    np.testing.assert_allclose(np.asarray(loss), np.asarray(ref_matched),
                               rtol=5e-3, atol=1e-5)
    # Loose sanity check against the pure-f32 (PyTorch-semantics) reference.
    ref_f32 = _reference_loss(x, y, w1, b1, w2, b2, bf16_matmul=False)
    np.testing.assert_allclose(np.asarray(loss), np.asarray(ref_f32),
                               rtol=5e-2, atol=1e-3)
    print("KERNEL_OK")
</pallas_src>

<mosaic_0001>
module attributes {stable_mosaic.version = 11 : i64} {
  func.func @_datacondition_kernel(%arg0: i32, %arg1: memref<8x4xf32, #tpu.memory_space<vmem>>, %arg2: memref<8x4xf32, #tpu.memory_space<vmem>>, %arg3: memref<4x32xbf16, #tpu.memory_space<vmem>>, %arg4: memref<1x32xf32, #tpu.memory_space<vmem>>, %arg5: memref<32x4xbf16, #tpu.memory_space<vmem>>, %arg6: memref<1x4xf32, #tpu.memory_space<vmem>>, %arg7: memref<1x8x128xf32, #tpu.memory_space<vmem>>) attributes {dimension_semantics = [#tpu.dimension_semantics<parallel>], iteration_bounds = array<i64: 2>, scalar_prefetch = 0 : i64, scratch_operands = 0 : i64, tpu.core_type = #tpu.core_type<tc>, window_params = [{transform_indices = @transform_0, window_bounds = array<i64: 8, 4>}, {transform_indices = @transform_1, window_bounds = array<i64: 8, 4>}, {pipeline_mode = #tpu.pipeline_mode<synchronous>, transform_indices = @transform_2, window_bounds = array<i64: 4, 32>}, {pipeline_mode = #tpu.pipeline_mode<synchronous>, transform_indices = @transform_3, window_bounds = array<i64: 1, 32>}, {pipeline_mode = #tpu.pipeline_mode<synchronous>, transform_indices = @transform_4, window_bounds = array<i64: 32, 4>}, {pipeline_mode = #tpu.pipeline_mode<synchronous>, transform_indices = @transform_5, window_bounds = array<i64: 1, 4>}, {transform_indices = @transform_6, window_bounds = array<i64: 1, 8, 128>}]} {
    %c0 = arith.constant 0 : index
    %c0_0 = arith.constant 0 : index
    %0 = vector.load %arg1[%c0, %c0_0] : memref<8x4xf32, #tpu.memory_space<vmem>>, vector<8x4xf32>
    %1 = arith.truncf %0 : vector<8x4xf32> to vector<8x4xbf16>
    %c0_1 = arith.constant 0 : index
    %c0_2 = arith.constant 0 : index
    %2 = vector.load %arg2[%c0_1, %c0_2] : memref<8x4xf32, #tpu.memory_space<vmem>>, vector<8x4xf32>
    %c0_3 = arith.constant 0 : index
    %c0_4 = arith.constant 0 : index
    %3 = vector.load %arg4[%c0_3, %c0_4] : memref<1x32xf32, #tpu.memory_space<vmem>>, vector<1x32xf32>
    %c0_5 = arith.constant 0 : index
    %c0_6 = arith.constant 0 : index
    %4 = vector.load %arg6[%c0_5, %c0_6] : memref<1x4xf32, #tpu.memory_space<vmem>>, vector<1x4xf32>
    %c0_7 = arith.constant 0 : index
    %c0_8 = arith.constant 0 : index
    %5 = vector.load %arg3[%c0_7, %c0_8] : memref<4x32xbf16, #tpu.memory_space<vmem>>, vector<4x32xbf16>
    %cst = arith.constant dense<0.000000e+00> : vector<8x32xf32>
    %6 = tpu.matmul %1, %5, %cst {dimension_numbers = #tpu.dot_dimension_numbers<[1], [0], [0], [1], [0, 0, 1, 1], [], []>} : vector<8x4xbf16>, vector<4x32xbf16>, vector<8x32xf32> -> vector<8x32xf32>
    %7 = vector.broadcast %3 : vector<1x32xf32> to vector<8x32xf32>
    %8 = arith.addf %6, %7 : vector<8x32xf32>
    %9 = math.tanh %8 : vector<8x32xf32>
    %10 = arith.truncf %9 : vector<8x32xf32> to vector<8x32xbf16>
    %c0_9 = arith.constant 0 : index
    %c0_10 = arith.constant 0 : index
    %11 = vector.load %arg5[%c0_9, %c0_10] : memref<32x4xbf16, #tpu.memory_space<vmem>>, vector<32x4xbf16>
    %cst_11 = arith.constant dense<0.000000e+00> : vector<8x4xf32>
    %12 = tpu.matmul %10, %11, %cst_11 {dimension_numbers = #tpu.dot_dimension_numbers<[1], [0], [0], [1], [0, 0, 1, 1], [], []>} : vector<8x32xbf16>, vector<32x4xbf16>, vector<8x4xf32> -> vector<8x4xf32>
    %13 = vector.broadcast %4 : vector<1x4xf32> to vector<8x4xf32>
    %14 = arith.addf %12, %13 : vector<8x4xf32>
    %15 = arith.subf %14, %2 : vector<8x4xf32>
    %16 = arith.mulf %15, %15 : vector<8x4xf32>
    %cst_12 = arith.constant dense<0.000000e+00> : vector<8xf32>
    %17 = vector.multi_reduction <add>, %16, %cst_12 [1] : vector<8x4xf32> to vector<8xf32>
    %18 = vector.shape_cast %17 : vector<8xf32> to vector<8x1xf32>
    %19 = arith.mulf %2, %2 : vector<8x4xf32>
    %cst_13 = arith.constant dense<0.000000e+00> : vector<8xf32>
    %20 = vector.multi_reduction <add>, %19, %cst_13 [1] : vector<8x4xf32> to vector<8xf32>
    %21 = vector.shape_cast %20 : vector<8xf32> to vector<8x1xf32>
    %22 = math.sqrt %18 : vector<8x1xf32>
    %23 = math.sqrt %21 : vector<8x1xf32>
    %cst_14 = arith.constant 9.99999993E-9 : f32
    %24 = vector.broadcast %cst_14 : f32 to vector<8x1xf32>
    %25 = arith.addf %23, %24 : vector<8x1xf32>
    %26 = tpu.reciprocal %25 {approx = true} : vector<8x1xf32> -> vector<8x1xf32>
    %27 = arith.mulf %22, %26 : vector<8x1xf32>
    %28 = vector.shape_cast %27 : vector<8x1xf32> to vector<1x8x1xf32>
    %cst_15 = arith.constant dense<0.000000e+00> : vector<1xf32>
    %29 = vector.multi_reduction <add>, %28, %cst_15 [1, 2] : vector<1x8x1xf32> to vector<1xf32>
    %30 = vector.shape_cast %29 : vector<1xf32> to vector<1x1x1xf32>
    %31 = vector.extract %30[0, 0, 0] : f32 from vector<1x1x1xf32>
    %32 = vector.broadcast %31 : f32 to vector<1x1x1xf32>
    %33 = vector.shape_cast %32 : vector<1x1x1xf32> to vector<1x1x1xf32>
    %34 = vector.broadcast %33 : vector<1x1x1xf32> to vector<1x8x128xf32>
    %c0_16 = arith.constant 0 : index
    %c0_17 = arith.constant 0 : index
    %c0_18 = arith.constant 0 : index
    %35 = vector.load %arg7[%c0_16, %c0_17, %c0_18] : memref<1x8x128xf32, #tpu.memory_space<vmem>>, vector<1x8x128xf32>
    tpu.vector_store %arg7[%c0_16, %c0_17, %c0_18], %34 {strides = array<i32>} : memref<1x8x128xf32, #tpu.memory_space<vmem>>, vector<1x8x128xf32>,
    return
  }
  func.func @transform_0(%arg0: i32) -> (i32, i32) {
    %c0_i32 = arith.constant 0 : i32
    %c0_i32_0 = arith.constant 0 : i32
    return %arg0, %c0_i32 : i32, i32
  }
  func.func @transform_1(%arg0: i32) -> (i32, i32) {
    %c0_i32 = arith.constant 0 : i32
    %c0_i32_0 = arith.constant 0 : i32
    return %arg0, %c0_i32 : i32, i32
  }
  func.func @transform_2(%arg0: i32) -> (i32, i32) {
    %c0_i32 = arith.constant 0 : i32
    %c0_i32_0 = arith.constant 0 : i32
    %c0_i32_1 = arith.constant 0 : i32
    return %c0_i32, %c0_i32_0 : i32, i32
  }
  func.func @transform_3(%arg0: i32) -> (i32, i32) {
    %c0_i32 = arith.constant 0 : i32
    %c0_i32_0 = arith.constant 0 : i32
    %c0_i32_1 = arith.constant 0 : i32
    return %c0_i32, %c0_i32_0 : i32, i32
  }
  func.func @transform_4(%arg0: i32) -> (i32, i32) {
    %c0_i32 = arith.constant 0 : i32
    %c0_i32_0 = arith.constant 0 : i32
    %c0_i32_1 = arith.constant 0 : i32
    return %c0_i32, %c0_i32_0 : i32, i32
  }
  func.func @transform_5(%arg0: i32) -> (i32, i32) {
    %c0_i32 = arith.constant 0 : i32
    %c0_i32_0 = arith.constant 0 : i32
    %c0_i32_1 = arith.constant 0 : i32
    return %c0_i32, %c0_i32_0 : i32, i32
  }
  func.func @transform_6(%arg0: i32) -> (i32, i32, i32) {
    %c0_i32 = arith.constant 0 : i32
    %c0_i32_0 = arith.constant 0 : i32
    %c0_i32_1 = arith.constant 0 : i32
    return %arg0, %c0_i32, %c0_i32_0 : i32, i32, i32
  }
}

</mosaic_0001>

<bundles_post_ra>
// kernel: tpu_custom_call.1
= control target key start
LH: loop header
LB: loop body
LE: loop exit
PB: predicated region body
PF: predicated region fallthrough
CT: control target
= control target key end

     0   :  { %11 = vsyncpa [#allocation3], 0  ;;  %s829_s0 = inlined_call_operand.vmem [shape: f32[16,4], index: 0, kind: input, shape index: {}]   ;;  %s830_s1 = inlined_call_operand.vmem [shape: f32[16,4], index: 1, kind: input, shape index: {}]   ;;  %s831_s2 = inlined_call_operand.vmem [shape: bf16[4,32], index: 2, kind: input, shape index: {}]   ;;  %s832_s3 = inlined_call_operand.vmem [shape: f32[1,32], index: 3, kind: input, shape index: {}]   ;;  %s833_s4 = inlined_call_operand.vmem [shape: bf16[32,4], index: 4, kind: input, shape index: {}]   ;;  %s834_s5 = inlined_call_operand.vmem [shape: f32[1,4], index: 5, kind: input, shape index: {}]   ;;  %s835_s6 = inlined_call_operand.hbm [shape: f32[2,8,128], index: 6, kind: output, shape index: {}]  }
   0x1   :  { %13 = vsyncpa [#allocation3 + $0x1], 0  ;;  %s708_s21 = smov 0   ;;  %s710_s22 = smov 0  }
   0x2   :  { %s712_s23 = smov 0   ;;  %s714_s24 = smov 0  }
   0x3 LB: > { %s729_s25 = sadd.s32 4294967295, %s668_s24   ;;  %s517_s26 = sadd.s32 4294967294, %s668_s24   ;;  %s668_s24 = sphi %s714_s24, %s841_s24   ;;  %s664_s23 = sphi %s712_s23, %s840_s23   ;;  %s660_s22 = sphi %s710_s22, %s839_s22   ;;  %s656_s21 = sphi %s708_s21, %s838_s21  }
   0x4   : > { %s733_s27 = sadd.s32 1, %s668_s24   ;;  %s162_s28 = sadd.s32 1, %s664_s23 }
   0x5   : > { %s159_s29 = ssub.s32 %s668_s24, %s733_s27  ;;  %p172_p0 = scmp.ne.s32.totalorder %s664_s23, %s660_s22 }
   0x6   : > { %p160_p1 = scmp.eq.s32.totalorder %s159_s29, 0  ;;  %p173_p2 = scmp.eq.s32.totalorder %s729_s25, 1 }
   0x7   : > { %p178_p3 = scmp.ne.s32.totalorder %s660_s22, %s656_s21  ;;  %p179_p4 = scmp.eq.s32.totalorder %s517_s26, 1 }
   0x8   : > { %s744_s30 = scalar_select %p160_p1, %s664_s23, %s162_s28  }
   0x9   : > { %p746_p5 = por %p173_p2, %p172_p0  ;;  %p750_p6 = por %p179_p4, %p178_p3 }
   0xa   : > { %p520_p7 = scmp.ge.s32.totalorder %s668_s24, 1  ;;  %p223_p8 = scmp.lt.s32.totalorder %s668_s24, 3 }
   0xc   : > { %p224_p9 = pnand %p520_p7, %p223_p8 }
   0xd   : > { %v270_v0 = vld [vmem:[%s831_s2] sm:$0x3] (!%p224_p9)  ;;  %vm281_vm0 = vcmask (!%p224_p9), 1041408   ;;  %p256_p10 = scmp.lt.s32.totalorder (!%p224_p9), %s729_s25, 1  ;;  %v670_v1 = vmov (!%p224_p9), 0.0   ;;  %vm671_vm1 = vmmov (!%p224_p9), 0  }
   0xe   : > { %227 = sbr.rel (%p224_p9) target bundleno = 853 (0x355), region = 44  ;;  %539 = vmatprep.subr.bf16.mxu0 (!%p224_p9), %v670_v1  ;;  %v283_v2 = vsel (!%p224_p9), %vm281_vm0, %v270_v0, 0  ;;  %541 = vmatprep.mubr.msk.bf16.mxu0 (!%p224_p9), %vm671_vm1, %v670_v1  ;;  %vm277_vm2 = vcmask (!%p224_p9), 31744   ;;  %v596_v5 = vld [vmem:[%s833_s4] sm:$0xff] (!%p224_p9)   ;;  %v597_v6 = vld [vmem:[%s833_s4 + $0x8] sm:$0xff] (!%p224_p9)   ;;  %vm349_vm3 = vcmask (!%p224_p9), 261120  }
   0xf   : > { %540 = vmatpush3.bf16.msra.mxu0 (!%p224_p9), %v283_v2  ;;  %545 = vmatprep.subr.bf16.mxu1 (!%p224_p9), %v670_v1  ;;  %v524_v10 = vld [vmem:[%s832_s3] ss:$0 sm:$0xff] (!%p224_p9)  ;;  %vm419_vm8 = vcmask (!%p224_p9), 7168   ;;  %s531_s16 = sshll.u32 (!%p224_p9), %s729_s25, 7 }
  0x10   : > { %549 = vmatprep.mubr.msk.bf16.mxu1 (!%p224_p9), %vm671_vm1, %v670_v1  ;;  %546 = vmatpush3.bf16.msra.mxu1 (!%p224_p9), %v596_v5  ;;  %v526_v18 = vld [vmem:[%s834_s5] ss:$0 sm:$0xff] (!%p224_p9)  ;;  %s789_s20 = scalar_lea.hbm (!%p224_p9), %s835_s6, %s531_s16 }
  0x11   : > { %547 = vmatprep.subr.bf16.mxu1 (!%p224_p9), %v670_v1 }
  0x14   : > { %548 = vmatpush3.bf16.msra.mxu1 (!%p224_p9), %v597_v6 }
  0x15   : > { %s257_s11 = scalar_select %p256_p10, %s729_s25, 1 }
  0x16   : > { %s672_s25 = smov [#allocation2]  }
  0x17   : > { %s522_s12 = sshll.u32 %s257_s11, 3  ;;  %s610_s29 = sshll.u32 %s672_s25, 4  ;;  %s611_s29 = int_to_ptr.vmem [resolvable:$false] %s610_s29 }
  0x18   : > { %s259_s15 = scalar_lea.vmem %s829_s0, %s522_s12  ;;  %s263_s28 = scalar_lea.vmem %s830_s1, %s522_s12 }
  0x19   : > { %v265_v3 = vld [vmem:[%s259_s15] sm:$0xff]  ;;  %s253_s12 = sand.u32 1, %s660_s22   ;;  %s612_s9 = scalar_lea.vmem %s611_s29, 256 }
  0x1a   : > { %v266_v4 = vpack.c.bf16 %v265_v3, %v265_v3  ;;  %v267_v7 = vld [vmem:[%s263_s28] sm:$0xff]  ;;  %s521_s13 = sshll.u32 %s253_s12, 3  ;;  %s433_s26 = scalar_lea.sflag [#allocation3], %s253_s12 }
  0x1b   : > { %v398_v8 = vmul.f32 %v267_v7, %v267_v7  ;;  %s255_s14 = scalar_lea.vmem [#allocation2], %s521_s13 }
  0x1c   : > { %542 = vmatmul.mubr.msk.bf16.vlgmr.msra.gmra.mrb[0].mxu0 %vm277_vm2, %v266_v4  ;;  %s446_s15 = sshll.u32 %s255_s14, 4  ;;  %s784_s15 = int_to_ptr.vmem [resolvable:$true] %s446_s15 }
  0x1d   : > { %v399_v9 = vsel %vm277_vm2, %v398_v8, 0.0  ;;  %s606_s28 = scalar_lea.vmem %s784_s15, 128  ;;  %p613_p0 = scmp.lt.s32.totalorder %s784_s15, %s611_s29 }
  0x1e   : > { %400 = vadd.xlane.f32.xlu0 %v399_v9  ;;  %p607_p11 = scmp.ne.s32.totalorder %s784_s15, %s606_s28  ;;  %p614_p1 = scmp.lt.s32.totalorder %s612_s9, %s606_s28 }
  0x20   : > { %p608_p12 = pnand %p607_p11, %p746_p5  ;;  %p615_p2 = por %p614_p1, %p613_p0 }
  0x22   : > { %p609_p13 = pneg %p608_p12 }
  0x24   : > { %p616_p3 = pnand %p615_p2, %p609_p13 }
  0xab   : > { %v401_v27 = vpop.xlane.xlu0 %400 }
  0xac   : > { %vm411_vm4 = vcmp.eq.f32.partialorder %v401_v27, inf  ;;  %v414_v30 = vand.u32 2147483648, %v401_v27  ;;  %vm413_vm5 = vcmp.eq.f32.partialorder %v401_v27, 0.0 }
  0xef   : > { %v319_v11 = vpop.f32.mrb[0].mxu0 }
  0xf0   : > { %v320_v12 = vadd.f32 %v524_v10, %v319_v11  ;;  %v543_v13 = vpop.f32.mrb[1].mxu0 }
  0xf1   : > { %v322_v14 = vpop.f32.mrb[2].mxu0 }
  0xf2   : > { %598 = vtanh.f32 %v320_v12  ;;  %v544_v15 = vpop.f32.mrb[3].mxu0 }
  0xf3   : > { %600 = vrsqrt.f32 %v401_v27 }
  0xfc   : > { %v599_v16 = vpop.eup %598 }
  0xfd   : > { %v326_v17 = vpack.c.bf16 %v599_v16, %v599_v16  ;;  %v601_v28 = vpop.eup %600 }
  0xfe   : > { %v410_v29 = vmul.f32 %v601_v28, %v401_v27 }
  0xff   : > { %550 = vmatmul.mubr.msk.bf16.vlgmr.msra.gmra.mrb[0].mxu1 %vm349_vm3, %v326_v17 }
 0x100   : > { %v412_v31 = vsel %vm411_vm4, %v401_v27, %v410_v29 }
 0x101   : > { %v415_v32 = vsel %vm413_vm5, %v414_v30, %v412_v31 }
 0x102   : > { %v416_v34 = vadd.f32 1e-08, %v415_v32 }
 0x1d2   : > { %v387_v19 = vpop.f32.mrb[0].mxu1 }
 0x1d3   : > { %v388_v20 = vadd.f32 %v526_v18, %v387_v19  ;;  %v551_v21 = vpop.f32.mrb[1].mxu1 }
 0x1d4   : > { %v390_v22 = vpop.f32.mrb[2].mxu1 }
 0x1d5   : > { %v393_v23 = vsub.f32 %v388_v20, %v267_v7  ;;  %v552_v24 = vpop.f32.mrb[3].mxu1 }
 0x1d7   : > { %v394_v25 = vmul.f32 %v393_v23, %v393_v23 }
 0x1d9   : > { %v395_v26 = vsel %vm277_vm2, %v394_v25, 0.0 }
 0x1da   : > { %396 = vadd.xlane.f32.xlu0 %v395_v26 }
 0x267   : > { %v397_v33 = vpop.xlane.xlu0 %396 }
 0x268   : > { %602 = vrsqrt.f32 %v397_v33  ;;  %vm404_vm6 = vcmp.eq.f32.partialorder %v397_v33, inf  ;;  %v407_v37 = vand.u32 2147483648, %v397_v33  ;;  %vm406_vm7 = vcmp.eq.f32.partialorder %v397_v33, 0.0 }
 0x269   : > { %604 = vrcp.f32 %v416_v34 }
 0x272   : > { %v603_v35 = vpop.eup %602 }
 0x273   : > { %v403_v36 = vmul.f32 %v603_v35, %v397_v33  ;;  %v605_v39 = vpop.eup %604 }
 0x275   : > { %v405_v38 = vsel %vm404_vm6, %v397_v33, %v403_v36 }
 0x276   : > { %v408_v40 = vsel %vm406_vm7, %v407_v37, %v405_v38 }
 0x277   : > { %v418_v41 = vmul.f32 %v605_v39, %v408_v40 }
 0x279   : > { %v420_v42 = vsel %vm419_vm8, %v418_v41, 0.0 }
 0x27a   : > { %421 = vadd.xlane.f32.xlu1 %v420_v42 }
 0x307   : > { %v422_v43 = vpop.xlane.xlu1 %421 }
 0x308   : > { %v423_v44 = vrot.slane %v422_v43, 4 }
 0x30a   : > { %v424_v45 = vadd.f32 %v423_v44, %v422_v43 }
 0x30c   : > { %v425_v46 = vrot.slane %v424_v45, 2 }
 0x30e   : > { %v426_v47 = vadd.f32 %v425_v46, %v424_v45 }
 0x310   : > { %v427_v48 = vrot.slane %v426_v47, 1 }
 0x312   : > { %v428_v49 = vadd.f32 %v427_v48, %v426_v47 }
 0x314   : > { %553 = vpush %v428_v49 }
 0x345   : > { %s554_s17 = spop %553 }
 0x346   : > { %v430_v50 = vstv %s554_s17 }
 0x347   : > { %431 = vst [vmem:[%s255_s14] sm:$0xff] %v430_v50 }
 0x348   : > { %619 = shalt.err (!%p616_p3)
}
 0x349   : > { %s620_s10 = scalar_lea.hbm %s789_s20, 128  ;;  %s624_s13 = scalar_lea.hbm %s835_s6, 256 }
 0x34a   : > { %p621_p4 = scmp.ne.s32.totalorder %s789_s20, %s620_s10  ;;  %p625_p9 = scmp.lt.u32.totalorder %s789_s20, %s835_s6 }
 0x34b   : > { %p626_p10 = scmp.lt.u32.totalorder %s624_s13, %s620_s10  ;;  %p628_p12 = scmp.lt.u32.totalorder %s620_s10, %s789_s20 }
 0x34c   : > { %p622_p7 = pnand %p621_p4, %p746_p5 }
 0x34d   : > { %p627_p11 = por %p626_p10, %p625_p9 }
 0x34e   : > { %p623_p8 = pneg %p622_p7 }
 0x34f   : > { %p629_p13 = por %p628_p12, %p627_p11 }
 0x351   : > { %p630_p0 = pnand %p629_p13, %p623_p8 }
 0x353   : > { %633 = shalt.err (!%p630_p0)
}
 0x354   : > { %555 = dma.vmem_to_hbm [thread:$0]  (%p746_p5), %s784_s15, 128, %s789_s20, %s433_s26  }
 0x355 PF: > { %p561_p1 = scmp.ge.s32.totalorder %s668_s24, 2  ;;  %s458_s17 = sand.u32 1, %s656_s21  }
 0x356   : > { %s459_s18 = scalar_lea.sflag [#allocation3], %s458_s17 }
 0x357   : > { %p558_p2 = pnand %p561_p1, %p750_p6 }
 0x359   : > { %651 = dma.done.wait (!%p558_p2), %s459_s18, 128  }
 0x35a   : > { %653 = vsyncadd (!%p558_p2), %s459_s18, 4294967168  ;;  %p16_p3 = scmp.ge.s32.totalorder %s733_s27, 4   ;;  %s838_s21 = smov %s660_s22 }
 0x35b   : > { %s839_s22 = smov %s664_s23  ;;  %s840_s23 = smov %s744_s30 }
 0x35c   : > { %s841_s24 = smov %s733_s27  ;;  %18 = sbr.rel (!%p16_p3) target bundleno = 3 (0x3), region = 82 }
 0x363   :  { %464 = vsyncpa [#allocation3], 1 }
 0x364   :  { %466 = vsyncpa [#allocation3 + $0x1], 1 }

</bundles_post_ra>
